<compile_context>
chip_gen: v7x
topology: tpu7x:2x2x1
jax: 0.10.0
libtpu: 0.0.40
codegen_flags: <defaults>
</compile_context>

<pallas_src>
import functools

import jax
import jax.numpy as jnp
from jax.experimental import pallas as pl
from jax.experimental.pallas import tpu as pltpu


def _round_up(n, m):
    return ((n + m - 1) // m) * m


# -----------------------------------------------------------------------------
# Pallas kernel: fused 2x(Linear+ReLU) + folded (Linear o LDA) in transposed
# (batch-on-lanes) layout.  One grid step processes a TB-wide batch tile.
# -----------------------------------------------------------------------------
def deeplda_kernel(xT_ref, w1_ref, b1_ref, w2_ref, b2_ref, w3l_ref, b3l_ref,
                   out_ref):
    xT = xT_ref[...]                                                  # (l0, TB)

    # Layer 1: Linear + ReLU
    h = jnp.dot(w1_ref[...], xT, preferred_element_type=jnp.float32) + b1_ref[...]
    h = jnp.maximum(h, 0.0)                                           # (l1, TB)

    # Layer 2: Linear + ReLU
    h = jnp.dot(w2_ref[...], h, preferred_element_type=jnp.float32) + b2_ref[...]
    h = jnp.maximum(h, 0.0)                                           # (l2, TB)

    # Layer 3 + LDA projection folded into a single (1, l2) x (l2, TB) matmul.
    out_ref[...] = (jnp.dot(w3l_ref[...], h, preferred_element_type=jnp.float32)
                    + b3l_ref[...])                                   # (1, TB)


# -----------------------------------------------------------------------------
# One-time parameter prep (hoisted out of the per-call path).
# -----------------------------------------------------------------------------
def prepare_params(params):
    """Keep weights in PyTorch (out, in) layout (that IS the transposed-compute
    layout), reshape biases to column vectors, and fold lda into layer 3."""
    w1, b1 = params["w1"], params["b1"]
    w2, b2 = params["w2"], params["b2"]
    w3, b3 = params["w3"], params["b3"]
    lda = params["lda"]                                   # (1, l3)
    return {
        "w1": w1, "b1": b1.reshape(-1, 1),
        "w2": w2, "b2": b2.reshape(-1, 1),
        "w3_lda": lda @ w3,                               # (1, l2)
        "b3_lda": lda @ b3.reshape(-1, 1),                # (1, 1)
    }


@functools.partial(jax.jit, static_argnames=("block_b",))
def deeplda_forward(x, prep, *, block_b=512):
    """x: (B, l0) float32, prep: output of prepare_params(). Returns (B, 1)."""
    B, l0 = x.shape
    l1 = prep["w1"].shape[0]
    l2 = prep["w2"].shape[0]

    # Batch tile: multiple of 128 (lane width), capped by block_b.
    # Resident weights + double-buffered (l0, TB) x tiles are tiny vs the
    # 32 MiB scoped VMEM default (and v7x's 64 MiB physical VMEM).
    TB = min(block_b, _round_up(B, 128))
    Bp = _round_up(B, TB)

    # Present x lane-dense: batch on the last (lane) axis, zero-padded to Bp.
    xT = jnp.zeros((l0, Bp), x.dtype).at[:, :B].set(x.T)

    resident = lambda i: (0, 0)   # same block every step -> stays VMEM-resident

    flops = 2 * B * (l0 * l1 + l1 * l2 + l2 * 1)
    bytes_accessed = 4 * (Bp * l0 + Bp + l1 * l0 + l1 + l2 * l1 + l2 + l2 + 1)

    outT = pl.pallas_call(
        deeplda_kernel,
        out_shape=jax.ShapeDtypeStruct((1, Bp), jnp.float32),
        grid=(Bp // TB,),
        in_specs=[
            pl.BlockSpec((l0, TB), lambda i: (0, i)),   # x tile (pipelined)
            pl.BlockSpec((l1, l0), resident),           # w1
            pl.BlockSpec((l1, 1), resident),            # b1
            pl.BlockSpec((l2, l1), resident),           # w2
            pl.BlockSpec((l2, 1), resident),            # b2
            pl.BlockSpec((1, l2), resident),            # lda @ w3
            pl.BlockSpec((1, 1), resident),             # lda @ b3
        ],
        out_specs=pl.BlockSpec((1, TB), lambda i: (0, i)),   # lane-dense output
        compiler_params=pltpu.CompilerParams(
            dimension_semantics=("parallel",),
            vmem_limit_bytes=32 * 1024 * 1024,
        ),
        cost_estimate=pl.CostEstimate(
            flops=flops, transcendentals=0, bytes_accessed=bytes_accessed),
    )(xT, prep["w1"], prep["b1"], prep["w2"], prep["b2"],
      prep["w3_lda"], prep["b3_lda"])

    # Back to the module's (B, 1) output convention.
    return outT[:, :B].T


# -----------------------------------------------------------------------------
# Deterministic parameter init (PyTorch nn.Linear default: U(-1/sqrt(in), ...))
# and a pure-JAX reference matching the PyTorch forward exactly.
# -----------------------------------------------------------------------------
def init_params(key, layer_sizes):
    params = {}
    ks = jax.random.split(key, 2 * (len(layer_sizes) - 1) + 1)
    for i in range(len(layer_sizes) - 1):
        fan_in, fan_out = layer_sizes[i], layer_sizes[i + 1]
        bound = 1.0 / jnp.sqrt(fan_in)
        params[f"w{i + 1}"] = jax.random.uniform(
            ks[2 * i], (fan_out, fan_in), minval=-bound, maxval=bound,
            dtype=jnp.float32)
        params[f"b{i + 1}"] = jax.random.uniform(
            ks[2 * i + 1], (fan_out,), minval=-bound, maxval=bound,
            dtype=jnp.float32)
    # lda vector: shape (1, l_last), as produced by set_lda(x.unsqueeze(0)).
    params["lda"] = jax.random.normal(ks[-1], (1, layer_sizes[-1]),
                                      dtype=jnp.float32)
    return params


def reference_forward(x, p):
    h = jnp.maximum(x @ p["w1"].T + p["b1"], 0.0)
    h = jnp.maximum(h @ p["w2"].T + p["b2"], 0.0)
    z = h @ p["w3"].T + p["b3"]
    return z @ p["lda"].T


# TODO(synk): set_norm()/normalize() path (normIn=True) is not exercised by the
# default forward and is left out of the kernel.

if __name__ == "__main__":
    # Small shapes consistent with the module: l = [16, 32, 32, 4], batch = 8.
    layer_sizes = [16, 32, 32, 4]
    B = 8

    key = jax.random.PRNGKey(0)
    kx, kp = jax.random.split(key)
    x = jax.random.normal(kx, (B, layer_sizes[0]), dtype=jnp.float32)
    params = init_params(kp, layer_sizes)
    prep = prepare_params(params)        # one-time prep, outside the call path

    out = deeplda_forward(x, prep)
    out = jax.block_until_ready(out)

    ref = reference_forward(x, params)
    assert out.shape == (B, 1), out.shape
    # LDA folding reorders the last reduction; tolerance loosened accordingly.
    assert jnp.allclose(out, ref, atol=1e-4, rtol=1e-4), "mismatch vs JAX reference"

    print("KERNEL_OK")
</pallas_src>

<mosaic_0001>
module attributes {stable_mosaic.version = 11 : i64} {
  func.func @deeplda_kernel(%arg0: i32, %arg1: memref<16x128xf32, #tpu.memory_space<vmem>>, %arg2: memref<32x16xf32, #tpu.memory_space<vmem>>, %arg3: memref<32x1xf32, #tpu.memory_space<vmem>>, %arg4: memref<32x32xf32, #tpu.memory_space<vmem>>, %arg5: memref<32x1xf32, #tpu.memory_space<vmem>>, %arg6: memref<1x32xf32, #tpu.memory_space<vmem>>, %arg7: memref<1x1xf32, #tpu.memory_space<vmem>>, %arg8: memref<1x128xf32, #tpu.memory_space<vmem>>) attributes {dimension_semantics = [#tpu.dimension_semantics<parallel>], iteration_bounds = array<i64: 1>, scalar_prefetch = 0 : i64, scratch_operands = 0 : i64, tpu.core_type = #tpu.core_type<tc>, window_params = [{transform_indices = @transform_0, window_bounds = array<i64: 16, 128>}, {pipeline_mode = #tpu.pipeline_mode<synchronous>, transform_indices = @transform_1, window_bounds = array<i64: 32, 16>}, {pipeline_mode = #tpu.pipeline_mode<synchronous>, transform_indices = @transform_2, window_bounds = array<i64: 32, 1>}, {pipeline_mode = #tpu.pipeline_mode<synchronous>, transform_indices = @transform_3, window_bounds = array<i64: 32, 32>}, {pipeline_mode = #tpu.pipeline_mode<synchronous>, transform_indices = @transform_4, window_bounds = array<i64: 32, 1>}, {pipeline_mode = #tpu.pipeline_mode<synchronous>, transform_indices = @transform_5, window_bounds = array<i64: 1, 32>}, {pipeline_mode = #tpu.pipeline_mode<synchronous>, transform_indices = @transform_6, window_bounds = array<i64: 1, 1>}, {transform_indices = @transform_7, window_bounds = array<i64: 1, 128>}]} {
    %c0 = arith.constant 0 : index
    %c0_0 = arith.constant 0 : index
    %0 = vector.load %arg1[%c0, %c0_0] : memref<16x128xf32, #tpu.memory_space<vmem>>, vector<16x128xf32>
    %c0_1 = arith.constant 0 : index
    %c0_2 = arith.constant 0 : index
    %1 = vector.load %arg2[%c0_1, %c0_2] : memref<32x16xf32, #tpu.memory_space<vmem>>, vector<32x16xf32>
    %cst = arith.constant dense<0.000000e+00> : vector<32x128xf32>
    %2 = tpu.matmul %1, %0, %cst {dimension_numbers = #tpu.dot_dimension_numbers<[1], [0], [0], [1], [0, 0, 1, 1], [], []>} : vector<32x16xf32>, vector<16x128xf32>, vector<32x128xf32> -> vector<32x128xf32>
    %c0_3 = arith.constant 0 : index
    %c0_4 = arith.constant 0 : index
    %3 = vector.load %arg3[%c0_3, %c0_4] : memref<32x1xf32, #tpu.memory_space<vmem>>, vector<32x1xf32>
    %4 = vector.broadcast %3 : vector<32x1xf32> to vector<32x128xf32>
    %5 = arith.addf %2, %4 : vector<32x128xf32>
    %cst_5 = arith.constant 0.000000e+00 : f32
    %6 = vector.broadcast %cst_5 : f32 to vector<32x128xf32>
    %7 = arith.maximumf %5, %6 : vector<32x128xf32>
    %c0_6 = arith.constant 0 : index
    %c0_7 = arith.constant 0 : index
    %8 = vector.load %arg4[%c0_6, %c0_7] : memref<32x32xf32, #tpu.memory_space<vmem>>, vector<32x32xf32>
    %cst_8 = arith.constant dense<0.000000e+00> : vector<32x128xf32>
    %9 = tpu.matmul %8, %7, %cst_8 {dimension_numbers = #tpu.dot_dimension_numbers<[1], [0], [0], [1], [0, 0, 1, 1], [], []>} : vector<32x32xf32>, vector<32x128xf32>, vector<32x128xf32> -> vector<32x128xf32>
    %c0_9 = arith.constant 0 : index
    %c0_10 = arith.constant 0 : index
    %10 = vector.load %arg5[%c0_9, %c0_10] : memref<32x1xf32, #tpu.memory_space<vmem>>, vector<32x1xf32>
    %11 = vector.broadcast %10 : vector<32x1xf32> to vector<32x128xf32>
    %12 = arith.addf %9, %11 : vector<32x128xf32>
    %cst_11 = arith.constant 0.000000e+00 : f32
    %13 = vector.broadcast %cst_11 : f32 to vector<32x128xf32>
    %14 = arith.maximumf %12, %13 : vector<32x128xf32>
    %c0_12 = arith.constant 0 : index
    %c0_13 = arith.constant 0 : index
    %15 = vector.load %arg6[%c0_12, %c0_13] : memref<1x32xf32, #tpu.memory_space<vmem>>, vector<1x32xf32>
    %cst_14 = arith.constant dense<0.000000e+00> : vector<1x128xf32>
    %16 = tpu.matmul %15, %14, %cst_14 {dimension_numbers = #tpu.dot_dimension_numbers<[1], [0], [0], [1], [0, 0, 1, 1], [], []>} : vector<1x32xf32>, vector<32x128xf32>, vector<1x128xf32> -> vector<1x128xf32>
    %c0_15 = arith.constant 0 : index
    %c0_16 = arith.constant 0 : index
    %17 = vector.load %arg7[%c0_15, %c0_16] : memref<1x1xf32, #tpu.memory_space<vmem>>, vector<1x1xf32>
    %18 = vector.broadcast %17 : vector<1x1xf32> to vector<1x128xf32>
    %19 = arith.addf %16, %18 : vector<1x128xf32>
    %c0_17 = arith.constant 0 : index
    %c0_18 = arith.constant 0 : index
    %20 = vector.load %arg8[%c0_17, %c0_18] : memref<1x128xf32, #tpu.memory_space<vmem>>, vector<1x128xf32>
    tpu.vector_store %arg8[%c0_17, %c0_18], %19 {strides = array<i32>} : memref<1x128xf32, #tpu.memory_space<vmem>>, vector<1x128xf32>,
    return
  }
  func.func @transform_0(%arg0: i32) -> (i32, i32) {
    %c0_i32 = arith.constant 0 : i32
    %c0_i32_0 = arith.constant 0 : i32
    return %c0_i32, %arg0 : i32, i32
  }
  func.func @transform_1(%arg0: i32) -> (i32, i32) {
    %c0_i32 = arith.constant 0 : i32
    %c0_i32_0 = arith.constant 0 : i32
    %c0_i32_1 = arith.constant 0 : i32
    return %c0_i32, %c0_i32_0 : i32, i32
  }
  func.func @transform_2(%arg0: i32) -> (i32, i32) {
    %c0_i32 = arith.constant 0 : i32
    %c0_i32_0 = arith.constant 0 : i32
    %c0_i32_1 = arith.constant 0 : i32
    return %c0_i32, %c0_i32_0 : i32, i32
  }
  func.func @transform_3(%arg0: i32) -> (i32, i32) {
    %c0_i32 = arith.constant 0 : i32
    %c0_i32_0 = arith.constant 0 : i32
    %c0_i32_1 = arith.constant 0 : i32
    return %c0_i32, %c0_i32_0 : i32, i32
  }
  func.func @transform_4(%arg0: i32) -> (i32, i32) {
    %c0_i32 = arith.constant 0 : i32
    %c0_i32_0 = arith.constant 0 : i32
    %c0_i32_1 = arith.constant 0 : i32
    return %c0_i32, %c0_i32_0 : i32, i32
  }
  func.func @transform_5(%arg0: i32) -> (i32, i32) {
    %c0_i32 = arith.constant 0 : i32
    %c0_i32_0 = arith.constant 0 : i32
    %c0_i32_1 = arith.constant 0 : i32
    return %c0_i32, %c0_i32_0 : i32, i32
  }
  func.func @transform_6(%arg0: i32) -> (i32, i32) {
    %c0_i32 = arith.constant 0 : i32
    %c0_i32_0 = arith.constant 0 : i32
    %c0_i32_1 = arith.constant 0 : i32
    return %c0_i32, %c0_i32_0 : i32, i32
  }
  func.func @transform_7(%arg0: i32) -> (i32, i32) {
    %c0_i32 = arith.constant 0 : i32
    %c0_i32_0 = arith.constant 0 : i32
    return %c0_i32, %arg0 : i32, i32
  }
}

</mosaic_0001>

<bundles_post_ra>
// kernel: deeplda_forward.1
= control target key start
LH: loop header
LB: loop body
LE: loop exit
PB: predicated region body
PF: predicated region fallthrough
CT: control target
= control target key end

     0   :  { %vm58_vm0 = vcmask 130048   ;;  %v466_v3 = vmov 0   ;;  %vm188_vm1 = vcmask 261120   ;;  %v467_v40 = vmov 0.0|0.0   ;;  %s582_s0 = inlined_call_operand.vmem [shape: f32[16,128], index: 0, kind: input, shape index: {}]   ;;  %s583_s1 = inlined_call_operand.vmem [shape: f32[32,16], index: 1, kind: input, shape index: {}]   ;;  %s584_s2 = inlined_call_operand.vmem [shape: f32[32,1], index: 2, kind: input, shape index: {}]   ;;  %s585_s6 = inlined_call_operand.<no memory space> [shape: f32[1,1], index: 6, kind: input, shape index: {}]   ;;  %s586_s4 = inlined_call_operand.vmem [shape: f32[32,1], index: 4, kind: input, shape index: {}]   ;;  %s587_s3 = inlined_call_operand.vmem [shape: f32[32,32], index: 3, kind: input, shape index: {}]   ;;  %s588_s5 = inlined_call_operand.vmem [shape: f32[1,32], index: 5, kind: input, shape index: {}]   ;;  %s589_s7 = inlined_call_operand.vmem [shape: f32[1,128], index: 7, kind: output, shape index: {}]  }
   0x1   :  { %v28_v0 = vld [vmem:[%s582_s0] sm:$0xff]  ;;  %v29_v1 = vld [vmem:[%s582_s0 + $0x8] sm:$0xff]  ;;  %464 = vset.pattern.permute.xlu0 %v466_v3  ;;  %465 = vset.pattern.permute.xlu1 %v466_v3  ;;  %v12_v4 = vstv %s585_s6  ;;  %v36_v7 = vld [vmem:[%s584_s2 + $0x10] sm:$0xff]  ;;  %vm468_vm2 = vmmov 0   ;;  %v469_v41 = vmov 0.0   ;;  %v297_v61 = vlaneseq }
   0x2   :  { %v30_v2 = vld [vmem:[%s583_s1] sm:$0xff]  ;;  %v442_v5 = vpack.c.bf16 %v29_v1, %v28_v0  ;;  %13 = vst [vmem:[#allocation2] sm:$0x1] %v12_v4  ;;  %v31_v8 = vld [vmem:[%s583_s1 + $0x8] sm:$0xff]  ;;  %50 = vperm.xlu1 %465, %v36_v7   ;;  %v32_v10 = vld [vmem:[%s583_s1 + $0x10] sm:$0xff] }
   0x3   :  { %411 = vmatprep.mubr.msk.f32.mxu0 %vm58_vm0, %v30_v2  ;;  %v34_v6 = vld [vmem:[%s584_s2] sm:$0xff]  ;;  %v35_v9 = vld [vmem:[%s584_s2 + $0x8] sm:$0xff]  ;;  %v37_v11 = vld [vmem:[%s584_s2 + $0x18] sm:$0xff]  ;;  %v298_v62 = vshrl.u32 %v297_v61, 7 }
   0x4   :  { %443 = vmatprep.subr.bf16.mxu0 %v442_v5  ;;  %40 = vperm.xlu0 %464, %v34_v6   ;;  %v33_v12 = vld [vmem:[%s583_s1 + $0x18] sm:$0xff]  ;;  %v164_v13 = vld [vmem:[%s586_s4] sm:$0xff]  ;;  %v165_v14 = vld [vmem:[%s586_s4 + $0x8] sm:$0xff] }
   0x5   :  { %445 = vmatpush3.bf16.msra.mxu0 %v442_v5  ;;  %v166_v15 = vld [vmem:[%s586_s4 + $0x10] sm:$0xff]  ;;  %v167_v16 = vld [vmem:[%s586_s4 + $0x18] sm:$0xff]  ;;  %v160_v18 = vld [vmem:[%s587_s3] sm:$0xff]  ;;  %v299_v63 = vsub.s32 0, %v298_v62 }
   0x6   :  { %55 = vperm.xlu1 %465, %v37_v11   ;;  %425 = vmatprep.mubr.msk.f32.mxu1 %vm188_vm1, %v160_v18  ;;  %v161_v37 = vld [vmem:[%s587_s3 + $0x8] sm:$0xff]  ;;  %v162_v38 = vld [vmem:[%s587_s3 + $0x10] sm:$0xff]  ;;  %v163_v39 = vld [vmem:[%s587_s3 + $0x18] sm:$0xff] }
   0x7   :  { %454 = vmatprep.subr.bf16.mxu0 %v467_v40  ;;  %v290_v60 = vld [vmem:[%s588_s5] sm:$0x1] }
   0x8   :  { %412 = vmatmul.mubr.msk.f32.vlgmr.msra.gmra.mrb[0].mxu0 %vm58_vm0, %v31_v8  ;;  %45 = vperm.xlu0 %464, %v35_v9  }
   0x9   :  { %414 = vmatprep.mubr.msk.f32.mxu0 %vm58_vm0, %v32_v10  ;;  %v291_v17 = vld [vmem:[#allocation2] sm:$0x1] }
   0xa   :  { %175 = vperm.xlu1 %465, %v165_v14  }
   0xc   :  { %415 = vmatmul.mubr.msk.f32.gmra.mrb[2].mxu0 %vm58_vm0, %v33_v12  ;;  %170 = vperm.xlu0 %464, %v164_v13  }
   0xd   :  { %439 = vmatprep.mubr.msk.f32.mxu0 %vm468_vm2, %v469_v41 }
   0xe   :  { %185 = vperm.xlu1 %465, %v167_v16  }
  0x10   :  { %180 = vperm.xlu0 %464, %v166_v15  }
  0x14   :  { %294 = vperm.xlu0 %464, %v291_v17  }
  0x81   :  { %v51_v20 = vpop.permute.xlu1 %50 }
  0x83   :  { %v41_v19 = vpop.permute.xlu0 %40 }
  0x85   :  { %v56_v27 = vpop.permute.xlu1 %55 }
  0x87   :  { %v46_v21 = vpop.permute.xlu0 %45 }
  0x89   :  { %v176_v42 = vpop.permute.xlu1 %175 }
  0x8b   :  { %v171_v43 = vpop.permute.xlu0 %170 }
  0x8d   :  { %v186_v49 = vpop.permute.xlu1 %185 }
  0x8f   :  { %v181_v52 = vpop.permute.xlu0 %180 }
  0x93   :  { %v295_v0 = vpop.permute.xlu0 %294 }
  0x94   :  { %v300_v1 = vrot.slane %v295_v0, %v299_v63 }
  0xdb   :  { %v413_v22 = vpop.f32.mrb[0].mxu0 }
  0xdc   :  { %v143_v23 = vadd.f32 %v413_v22, %v46_v21  ;;  %v137_v24 = vpop.f32.mrb[1].mxu0 }
  0xdd   :  { %v138_v25 = vadd.f32 %v137_v24, %v41_v19 }
  0xde   :  { %v157_v26 = vmax.f32 %v143_v23, 0.0 }
  0xdf   :  { %v156_v28 = vmax.f32 %v138_v25, 0.0  ;;  %v416_v29 = vpop.f32.mrb[2].mxu0 }
  0xe0   :  { %v153_v30 = vadd.f32 %v416_v29, %v56_v27  ;;  %v147_v31 = vpop.f32.mrb[3].mxu0 }
  0xe1   :  { %v148_v32 = vadd.f32 %v147_v31, %v51_v20  ;;  %v446_v33 = vpack.c.bf16 %v157_v26, %v156_v28 }
  0xe2   :  { %v159_v34 = vmax.f32 %v153_v30, 0.0 }
  0xe3   :  { %v158_v35 = vmax.f32 %v148_v32, 0.0  ;;  %447 = vmatprep.subr.bf16.mxu1 %v446_v33 }
  0xe4   :  { %449 = vmatpush3.bf16.msra.mxu1 %v446_v33 }
  0xe5   :  { %v450_v36 = vpack.c.bf16 %v159_v34, %v158_v35 }
  0xe7   :  { %451 = vmatprep.subr.bf16.mxu1 %v450_v36 }
  0xe8   :  { %453 = vmatpush3.bf16.msra.mxu1 %v450_v36 }
  0xeb   :  { %426 = vmatmul.mubr.msk.f32.vlgmr.msra.gmra.mrb[0].mxu1 %vm188_vm1, %v161_v37 }
  0xec   :  { %428 = vmatprep.mubr.msk.f32.mxu1 %vm188_vm1, %v162_v38 }
  0xef   :  { %429 = vmatmul.mubr.msk.f32.gmra.mrb[2].mxu1 %vm188_vm1, %v163_v39 }
 0x1be   :  { %v427_v44 = vpop.f32.mrb[0].mxu1 }
 0x1bf   :  { %v273_v45 = vadd.f32 %v427_v44, %v176_v42  ;;  %v267_v46 = vpop.f32.mrb[1].mxu1 }
 0x1c0   :  { %v268_v47 = vadd.f32 %v267_v46, %v171_v43 }
 0x1c1   :  { %v287_v48 = vmax.f32 %v273_v45, 0.0 }
 0x1c2   :  { %v286_v50 = vmax.f32 %v268_v47, 0.0  ;;  %v430_v51 = vpop.f32.mrb[2].mxu1 }
 0x1c3   :  { %v283_v53 = vadd.f32 %v430_v51, %v186_v49  ;;  %v277_v54 = vpop.f32.mrb[3].mxu1 }
 0x1c4   :  { %v455_v55 = vpack.c.bf16 %v287_v48, %v286_v50  ;;  %v278_v56 = vadd.f32 %v277_v54, %v181_v52 }
 0x1c5   :  { %v289_v57 = vmax.f32 %v283_v53, 0.0 }
 0x1c6   :  { %v288_v58 = vmax.f32 %v278_v56, 0.0  ;;  %456 = vmatpush3.bf16.msra.mxu0 %v455_v55 }
 0x1c7   :  { %457 = vmatprep.subr.bf16.mxu0 %v467_v40 }
 0x1c8   :  { %v458_v59 = vpack.c.bf16 %v289_v57, %v288_v58 }
 0x1ca   :  { %459 = vmatpush3.bf16.msra.mxu0 %v458_v59 }
 0x1cd   :  { %440 = vmatmul.mubr.msk.f32.vlgmr.msra.gmra.mrb[4].mxu0 %vm188_vm1, %v290_v60 }
 0x2a0   :  { %v370_v2 = vpop.f32.mrb[4].mxu0 }
 0x2a1   :  { %v371_v3 = vadd.f32 %v370_v2, %v300_v1  ;;  %v441_v4 = vpop.f32.mrb[5].mxu0 }
 0x2a3   :  { %374 = vst [vmem:[%s589_s7] sm:$0x1] %v371_v3 }

</bundles_post_ra>
